<compile_context>
chip_gen: v5e
topology: v5e:2x2
jax: 0.10.0
libtpu: 0.0.40
codegen_flags: <defaults>
</compile_context>

<pallas_src>
import functools

import jax
import jax.numpy as jnp
from jax.experimental import pallas as pl
from jax.experimental.pallas import tpu as pltpu


def channel_gate_kernel(x_ref, w1t_ref, b1_ref, w2t_ref, b2_ref, o_ref, *, hw_true):
    # x_ref: (1, C, HWp) f32 block for one batch element.
    x = x_ref[0]                            # (C, HWp)
    c, hwp = x.shape
    inv_hw = 1.0 / float(hw_true)           # precomputed reciprocal: mul, not divide

    # ---- global pools over the spatial (lane) axis -> (C, 1) columns ----
    # NOTE(v5e): the sum could instead be a jnp.dot against a ones column to
    # move it onto the MXU and leave only the max on the XLU.
    avg_col = jnp.sum(x, axis=-1, keepdims=True) * inv_hw            # (C, 1)

    if hwp == hw_true:
        x_for_max = x
    else:
        # zero-padded lanes must not win the max
        lane = jax.lax.broadcasted_iota(jnp.int32, (c, hwp), 1)
        x_for_max = jnp.where(lane < hw_true, x, jnp.finfo(jnp.float32).min)
    max_col = jnp.max(x_for_max, axis=-1, keepdims=True)             # (C, 1)

    pooled = jnp.concatenate([avg_col, max_col], axis=-1)            # (C, 2)

    # ---- fused MLP over both pools (transposed / column layout) ----
    w1t = w1t_ref[...]                      # (Ch, C)
    b1 = b1_ref[...]                        # (Ch, 1)
    w2t = w2t_ref[...]                      # (C, Ch)
    b2 = b2_ref[...]                        # (C, 1)

    h = jnp.dot(w1t, pooled, preferred_element_type=jnp.float32) + b1   # (Ch, 2)
    h = jnp.maximum(h, 0.0)
    att2 = jnp.dot(w2t, h, preferred_element_type=jnp.float32)          # (C, 2)
    # MLP(avg) + MLP(max) = w2t @ (h_avg + h_max) + 2*b2
    att = jnp.sum(att2, axis=-1, keepdims=True) + 2.0 * b2              # (C, 1)

    scale = jax.nn.sigmoid(att)                                         # (C, 1)

    # (C, 1) per-channel scale lane-broadcasts over the (C, HWp) slab.
    o_ref[0] = x * scale


def channel_gate(x, w1, b1, w2, b2):
    """ChannelGate forward.

    x : (B, C, H, W) float32
    w1: (C, Ch),  b1: (Ch,)   -- Linear(C, Ch)
    w2: (Ch, C),  b2: (C,)    -- Linear(Ch, C)
    Returns (B, C, H, W) float32.
    """
    B, C, H, W = x.shape
    Ch = w1.shape[1]
    HW = H * W
    HWp = ((HW + 127) // 128) * 128         # lane-dense spatial axis

    x_flat = x.reshape(B, C, HW)
    if HWp != HW:
        x_flat = jnp.pad(x_flat, ((0, 0), (0, 0), (0, HWp - HW)))

    # Transposed weights / column biases for the column-oriented kernel MLP.
    w1t = w1.T                              # (Ch, C)
    w2t = w2.T                              # (C, Ch)
    b1c = b1.reshape(Ch, 1)
    b2c = b2.reshape(C, 1)

    # x/out double-buffered per-image slabs + resident weights + headroom.
    block_bytes = C * HWp * 4
    weight_bytes = 4 * (w1t.size + w2t.size + b1c.size + b2c.size)
    vmem_limit = int(
        min(max(4 * block_bytes + 2 * weight_bytes + (4 << 20), 16 << 20), 60 << 20)
    )

    kernel = functools.partial(channel_gate_kernel, hw_true=HW)

    out = pl.pallas_call(
        kernel,
        out_shape=jax.ShapeDtypeStruct((B, C, HWp), jnp.float32),
        grid=(B,),
        in_specs=[
            pl.BlockSpec((1, C, HWp), lambda b: (b, 0, 0)),
            pl.BlockSpec((Ch, C), lambda b: (0, 0)),
            pl.BlockSpec((Ch, 1), lambda b: (0, 0)),
            pl.BlockSpec((C, Ch), lambda b: (0, 0)),
            pl.BlockSpec((C, 1), lambda b: (0, 0)),
        ],
        out_specs=pl.BlockSpec((1, C, HWp), lambda b: (b, 0, 0)),
        compiler_params=pltpu.CompilerParams(
            dimension_semantics=("parallel",),
            vmem_limit_bytes=vmem_limit,
        ),
    )(x_flat, w1t, b1c, w2t, b2c)

    return out[:, :, :HW].reshape(B, C, H, W)


def channel_gate_ref(x, w1, b1, w2, b2):
    """Pure-JAX reference mirroring the PyTorch forward."""
    B, C, H, W = x.shape
    x_flat = x.reshape(B, C, H * W)
    avg_pool = jnp.mean(x_flat, axis=-1)
    max_pool = jnp.max(x_flat, axis=-1)

    def mlp(v):
        h = jnp.maximum(v @ w1 + b1.reshape(1, -1), 0.0)
        return h @ w2 + b2.reshape(1, -1)

    att = mlp(avg_pool) + mlp(max_pool)
    scale = jax.nn.sigmoid(att)
    return x * scale[:, :, None, None]


def _run_case(key, B, C, H, W, reduction_ratio):
    Ch = C // reduction_ratio
    kx, k1, k2, k3, k4 = jax.random.split(key, 5)
    x = jax.random.normal(kx, (B, C, H, W), dtype=jnp.float32)
    bound1 = 1.0 / jnp.sqrt(C)
    bound2 = 1.0 / jnp.sqrt(Ch)
    w1 = jax.random.uniform(k1, (C, Ch), jnp.float32, -bound1, bound1)
    b1 = jax.random.uniform(k2, (Ch,), jnp.float32, -bound1, bound1)
    w2 = jax.random.uniform(k3, (Ch, C), jnp.float32, -bound2, bound2)
    b2 = jax.random.uniform(k4, (C,), jnp.float32, -bound2, bound2)

    out = jax.block_until_ready(channel_gate(x, w1, b1, w2, b2))
    ref = channel_gate_ref(x, w1, b1, w2, b2)
    assert out.shape == (B, C, H, W)
    assert jnp.allclose(out, ref, atol=1e-5, rtol=1e-5), (
        f"mismatch vs reference for shape {(B, C, H, W)}"
    )


if __name__ == "__main__":
    key = jax.random.PRNGKey(0)
    k_a, k_b = jax.random.split(key)
    # H*W already a multiple of 128 (lane-dense, no masking path).
    _run_case(k_a, B=2, C=32, H=16, W=16, reduction_ratio=4)
    # H*W = 49 -> padded to 128 (exercises lane padding + max-pool masking).
    _run_case(k_b, B=2, C=32, H=7, W=7, reduction_ratio=8)
    print("KERNEL_OK")
</pallas_src>

<mosaic_0001>
module attributes {stable_mosaic.version = 11 : i64} {
  func.func @channel_gate_kernel(%arg0: i32, %arg1: memref<1x32x256xf32, #tpu.memory_space<vmem>>, %arg2: memref<8x32xf32, #tpu.memory_space<vmem>>, %arg3: memref<8x1xf32, #tpu.memory_space<vmem>>, %arg4: memref<32x8xf32, #tpu.memory_space<vmem>>, %arg5: memref<32x1xf32, #tpu.memory_space<vmem>>, %arg6: memref<1x32x256xf32, #tpu.memory_space<vmem>>) attributes {dimension_semantics = [#tpu.dimension_semantics<parallel>], iteration_bounds = array<i64: 2>, scalar_prefetch = 0 : i64, scratch_operands = 0 : i64, tpu.core_type = #tpu.core_type<tc>, window_params = [{transform_indices = @transform_0, window_bounds = array<i64: 1, 32, 256>}, {pipeline_mode = #tpu.pipeline_mode<synchronous>, transform_indices = @transform_1, window_bounds = array<i64: 8, 32>}, {pipeline_mode = #tpu.pipeline_mode<synchronous>, transform_indices = @transform_2, window_bounds = array<i64: 8, 1>}, {pipeline_mode = #tpu.pipeline_mode<synchronous>, transform_indices = @transform_3, window_bounds = array<i64: 32, 8>}, {pipeline_mode = #tpu.pipeline_mode<synchronous>, transform_indices = @transform_4, window_bounds = array<i64: 32, 1>}, {transform_indices = @transform_5, window_bounds = array<i64: 1, 32, 256>}]} {
    %c0 = arith.constant 0 : index
    %c0_0 = arith.constant 0 : index
    %c0_1 = arith.constant 0 : index
    %0 = vector.load %arg1[%c0, %c0_0, %c0_1] : memref<1x32x256xf32, #tpu.memory_space<vmem>>, vector<1x32x256xf32>
    %1 = vector.shape_cast %0 : vector<1x32x256xf32> to vector<32x256xf32>
    %cst = arith.constant dense<0.000000e+00> : vector<32xf32>
    %2 = vector.multi_reduction <add>, %1, %cst [1] : vector<32x256xf32> to vector<32xf32>
    %3 = vector.shape_cast %2 : vector<32xf32> to vector<32x1xf32>
    %cst_2 = arith.constant 3.906250e-03 : f32
    %4 = vector.broadcast %cst_2 : f32 to vector<32x1xf32>
    %5 = arith.mulf %3, %4 : vector<32x1xf32>
    %cst_3 = arith.constant dense<0xFF800000> : vector<32xf32>
    %6 = vector.multi_reduction <maximumf>, %1, %cst_3 [1] : vector<32x256xf32> to vector<32xf32>
    %7 = vector.shape_cast %6 : vector<32xf32> to vector<32x1xf32>
    %8 = tpu.concatenate %5, %7 in 1 : vector<32x1xf32>, vector<32x1xf32> -> vector<32x2xf32>
    %c0_4 = arith.constant 0 : index
    %c0_5 = arith.constant 0 : index
    %9 = vector.load %arg2[%c0_4, %c0_5] : memref<8x32xf32, #tpu.memory_space<vmem>>, vector<8x32xf32>
    %c0_6 = arith.constant 0 : index
    %c0_7 = arith.constant 0 : index
    %10 = vector.load %arg3[%c0_6, %c0_7] : memref<8x1xf32, #tpu.memory_space<vmem>>, vector<8x1xf32>
    %c0_8 = arith.constant 0 : index
    %c0_9 = arith.constant 0 : index
    %11 = vector.load %arg4[%c0_8, %c0_9] : memref<32x8xf32, #tpu.memory_space<vmem>>, vector<32x8xf32>
    %c0_10 = arith.constant 0 : index
    %c0_11 = arith.constant 0 : index
    %12 = vector.load %arg5[%c0_10, %c0_11] : memref<32x1xf32, #tpu.memory_space<vmem>>, vector<32x1xf32>
    %cst_12 = arith.constant dense<0.000000e+00> : vector<8x2xf32>
    %13 = tpu.matmul %9, %8, %cst_12 {dimension_numbers = #tpu.dot_dimension_numbers<[1], [0], [0], [1], [0, 0, 1, 1], [], []>} : vector<8x32xf32>, vector<32x2xf32>, vector<8x2xf32> -> vector<8x2xf32>
    %14 = vector.broadcast %10 : vector<8x1xf32> to vector<8x2xf32>
    %15 = arith.addf %13, %14 : vector<8x2xf32>
    %cst_13 = arith.constant 0.000000e+00 : f32
    %16 = vector.broadcast %cst_13 : f32 to vector<8x2xf32>
    %17 = arith.maximumf %15, %16 : vector<8x2xf32>
    %cst_14 = arith.constant dense<0.000000e+00> : vector<32x2xf32>
    %18 = tpu.matmul %11, %17, %cst_14 {dimension_numbers = #tpu.dot_dimension_numbers<[1], [0], [0], [1], [0, 0, 1, 1], [], []>} : vector<32x8xf32>, vector<8x2xf32>, vector<32x2xf32> -> vector<32x2xf32>
    %cst_15 = arith.constant dense<0.000000e+00> : vector<32xf32>
    %19 = vector.multi_reduction <add>, %18, %cst_15 [1] : vector<32x2xf32> to vector<32xf32>
    %20 = vector.shape_cast %19 : vector<32xf32> to vector<32x1xf32>
    %cst_16 = arith.constant 2.000000e+00 : f32
    %21 = vector.broadcast %cst_16 : f32 to vector<32x1xf32>
    %22 = arith.mulf %21, %12 : vector<32x1xf32>
    %23 = arith.addf %20, %22 : vector<32x1xf32>
    %24 = arith.negf %23 : vector<32x1xf32>
    %25 = math.exp %24 : vector<32x1xf32>
    %cst_17 = arith.constant 1.000000e+00 : f32
    %26 = vector.broadcast %cst_17 : f32 to vector<32x1xf32>
    %27 = arith.addf %26, %25 : vector<32x1xf32>
    %28 = arith.divf %26, %27 : vector<32x1xf32>
    %29 = vector.broadcast %28 : vector<32x1xf32> to vector<32x256xf32>
    %30 = arith.mulf %1, %29 : vector<32x256xf32>
    %c0_18 = arith.constant 0 : index
    %c0_19 = arith.constant 0 : index
    %c0_20 = arith.constant 0 : index
    %31 = vector.load %arg6[%c0_18, %c0_19, %c0_20] : memref<1x32x256xf32, #tpu.memory_space<vmem>>, vector<1x32x256xf32>
    %32 = vector.shape_cast %31 : vector<1x32x256xf32> to vector<32x256xf32>
    %33 = vector.shape_cast %30 : vector<32x256xf32> to vector<1x32x256xf32>
    tpu.vector_store %arg6[%c0_18, %c0_19, %c0_20], %33 {strides = array<i32>} : memref<1x32x256xf32, #tpu.memory_space<vmem>>, vector<1x32x256xf32>,
    return
  }
  func.func @transform_0(%arg0: i32) -> (i32, i32, i32) {
    %c0_i32 = arith.constant 0 : i32
    %c0_i32_0 = arith.constant 0 : i32
    %c0_i32_1 = arith.constant 0 : i32
    return %arg0, %c0_i32, %c0_i32_0 : i32, i32, i32
  }
  func.func @transform_1(%arg0: i32) -> (i32, i32) {
    %c0_i32 = arith.constant 0 : i32
    %c0_i32_0 = arith.constant 0 : i32
    %c0_i32_1 = arith.constant 0 : i32
    return %c0_i32, %c0_i32_0 : i32, i32
  }
  func.func @transform_2(%arg0: i32) -> (i32, i32) {
    %c0_i32 = arith.constant 0 : i32
    %c0_i32_0 = arith.constant 0 : i32
    %c0_i32_1 = arith.constant 0 : i32
    return %c0_i32, %c0_i32_0 : i32, i32
  }
  func.func @transform_3(%arg0: i32) -> (i32, i32) {
    %c0_i32 = arith.constant 0 : i32
    %c0_i32_0 = arith.constant 0 : i32
    %c0_i32_1 = arith.constant 0 : i32
    return %c0_i32, %c0_i32_0 : i32, i32
  }
  func.func @transform_4(%arg0: i32) -> (i32, i32) {
    %c0_i32 = arith.constant 0 : i32
    %c0_i32_0 = arith.constant 0 : i32
    %c0_i32_1 = arith.constant 0 : i32
    return %c0_i32, %c0_i32_0 : i32, i32
  }
  func.func @transform_5(%arg0: i32) -> (i32, i32, i32) {
    %c0_i32 = arith.constant 0 : i32
    %c0_i32_0 = arith.constant 0 : i32
    %c0_i32_1 = arith.constant 0 : i32
    return %arg0, %c0_i32, %c0_i32_0 : i32, i32, i32
  }
}

</mosaic_0001>

<bundles_post_ra>
// kernel: tpu_custom_call.1
= control target key start
LH: loop header
LB: loop body
LE: loop exit
PB: predicated region body
PF: predicated region fallthrough
CT: control target
= control target key end

     0   :  { %10 = vsyncpa [#allocation3], 0  ;;  %s1025_s0 = inlined_call_operand.hbm [shape: f32[2,32,256], index: 0, kind: input, shape index: {}]   ;;  %s1026_s1 = inlined_call_operand.vmem [shape: f32[8,32], index: 1, kind: input, shape index: {}]   ;;  %s1027_s2 = inlined_call_operand.vmem [shape: f32[8,1], index: 2, kind: input, shape index: {}]   ;;  %s1028_s3 = inlined_call_operand.vmem [shape: f32[32,8], index: 3, kind: input, shape index: {}]   ;;  %s1029_s4 = inlined_call_operand.vmem [shape: f32[32,1], index: 4, kind: input, shape index: {}]   ;;  %s1030_s5 = inlined_call_operand.hbm [shape: f32[2,32,256], index: 5, kind: output, shape index: {}]  }
   0x1   :  { %12 = vsyncpa [#allocation3 + $0x1], 0 }
   0x2   :  { %13 = vsyncpa [#allocation4], 0 }
   0x3   :  { %15 = vsyncpa [#allocation4 + $0x1], 0  ;;  %s820_s18 = smov 0   ;;  %s822_s19 = smov 0  }
   0x4   :  { %s824_s20 = smov 0   ;;  %s826_s21 = smov 0  }
   0x5 LB: > { %s841_s22 = sadd.s32 4294967295, %s783_s21   ;;  %s590_s23 = sadd.s32 4294967294, %s783_s21   ;;  %s783_s21 = sphi %s826_s21, %s1040_s21   ;;  %s779_s20 = sphi %s824_s20, %s1039_s20   ;;  %s775_s19 = sphi %s822_s19, %s1038_s19   ;;  %s771_s18 = sphi %s820_s18, %s1037_s18  }
   0x6   : > { %s845_s24 = sadd.s32 1, %s783_s21   ;;  %s28_s25 = sadd.s32 1, %s779_s20 }
   0x7   : > { %s25_s26 = ssub.s32 %s783_s21, %s845_s24  ;;  %p35_p0 = scmp.ne.s32.totalorder %s779_s20, %s775_s19 }
   0x8   : > { %p26_p1 = scmp.eq.s32.totalorder %s25_s26, 0  ;;  %p36_p2 = scmp.eq.s32.totalorder %s783_s21, 0 }
   0x9   : > { %p41_p3 = scmp.ne.s32.totalorder %s775_s19, %s771_s18  ;;  %p42_p4 = scmp.eq.s32.totalorder %s841_s22, 0 }
   0xa   : > { %s857_s27 = scalar_select %p26_p1, %s779_s20, %s28_s25  }
   0xb   : > { %p859_p5 = por %p36_p2, %p35_p0  ;;  %p863_p6 = por %p42_p4, %p41_p3 }
   0xc   : > { %p149_p7 = scmp.eq.s32.totalorder %s841_s22, 1  ;;  %p155_p8 = scmp.eq.s32.totalorder %s590_s23, 1 }
   0xd   : > { %p629_p10 = scmp.lt.s32.totalorder %s783_s21, 2  ;;  %s187_s7 = sand.u32 1, %s779_s20  }
   0xe   : > { %p870_p11 = por %p149_p7, %p35_p0  ;;  %p874_p12 = por %p155_p8, %p41_p3 }
   0xf   : > { %s613_s8 = sshll.u32 %s783_s21, 6  ;;  %s593_s9 = sshll.u32 %s187_s7, 6 }
  0x10   : > { %s196_s12 = scalar_lea.hbm %s1025_s0, %s613_s8  ;;  %s191_s14 = scalar_lea.vmem [#allocation2], %s593_s9 }
  0x11   : > { %s197_s13 = sshll.u32 %s196_s12, 4  ;;  %s199_s15 = sshll.u32 %s191_s14, 4  ;;  %s198_s13 = int_to_ptr.hbm [resolvable:$true] %s197_s13  ;;  %s200_s15 = int_to_ptr.vmem [resolvable:$true] %s199_s15 }
  0x12   : > { %p885_p13 = pnand %p629_p10, %p859_p5  ;;  %p596_p0 = scmp.ge.s32.totalorder %s783_s21, 1 }
  0x13   : > { %p207_p1 = scmp.lt.s32.totalorder %s783_s21, 3  ;;  %s188_s17 = scalar_lea.sflag [#allocation3], %s187_s7 }
  0x14   : > { %s687_s23 = sshra.s32 %s198_s13, 4  ;;  %p691_p3 = pneg %p885_p13  ;;  %s688_s23 = int_to_ptr.hbm [resolvable:$true] %s687_s23 }
  0x15   : > { %s689_s25 = scalar_lea.hbm %s688_s23, 64  ;;  %s694_s28 = scalar_lea.hbm %s1025_s0, 128 }
  0x16   : > { %p690_p2 = scmp.ne.s32.totalorder %s688_s23, %s689_s25  ;;  %p695_p5 = scmp.lt.s32.totalorder %s688_s23, %s1025_s0 }
  0x17   : > { %p696_p8 = scmp.lt.s32.totalorder %s694_s28, %s689_s25 }
  0x18   : > { %p692_p4 = pnand %p691_p3, %p690_p2 }
  0x19   : > { %p697_p10 = por %p696_p8, %p695_p5 }
  0x1a   : > { %p693_p7 = pneg %p692_p4 }
  0x1c   : > { %p698_p9 = pnand %p697_p10, %p693_p7 }
  0x1e   : > { %701 = shalt.err (!%p698_p9)
}
  0x1f   : > { %s785_s7 = smov 256   ;;  %s786_s11 = smov 16  }
  0x20   : > { %624 = dma.hbm_to_vmem [thread:$0]  (!%p885_p13), %s198_s13, 1024, %s200_s15, %s188_s17, %s785_s7, %s785_s7, %s786_s11  }
  0x21   : > { %p208_p2 = pnand %p596_p0, %p207_p1 }
  0x22   : > { %s906_s12 = sand.u32 (!%p208_p2), 1, %s775_s19  }
  0x23   : > { %211 = sbr.rel (%p208_p2) target bundleno = 713 (0x2c9), region = 40  ;;  %s597_s14 = sshll.u32 (!%p208_p2), %s906_s12, 6 }
  0x24   : > { %s214_s23 = scalar_lea.sflag (!%p208_p2), [#allocation3], %s906_s12  ;;  %s217_s25 = scalar_lea.vmem (!%p208_p2), [#allocation2], %s597_s14 }
  0x28   : > { %762 = dma.done.wait (%p863_p6), %s214_s23, 1024  }
  0x29   : > { %764 = vsyncadd (%p863_p6), %s214_s23, 4294966272  ;;  %v916_v0 = vld [vmem:[%s217_s25 + $0x30] sm:$0xff]  ;;  %v918_v1 = vld [vmem:[%s217_s25 + $0x38] sm:$0xff]  ;;  %v787_v17 = vmov 0   ;;  %vm281_vm0 = vcmask 7168   ;;  %vm301_vm1 = vcmask 261120  }
  0x2a   : > { %v920_v2 = vld [vmem:[%s217_s25 + $0x20] sm:$0xff]  ;;  %v262_v3 = vadd.f32 %v918_v1, %v916_v0  ;;  %v278_v4 = vmax.f32 %v916_v0, %v918_v1  ;;  %v926_v5 = vld [vmem:[%s217_s25 + $0x28] sm:$0xff]  ;;  %v930_v7 = vld [vmem:[%s217_s25 + $0x10] sm:$0xff]  ;;  %668 = vset.pattern.permute.xlu2 %v787_v17  ;;  %669 = vset.pattern.permute.xlu0 %v787_v17  ;;  %vm326_vm2 = vcmask 64512   ;;  %vm368_vm3 = vcmask 15360   ;;  %s244_s8 = scalar_lea.vmem [#allocation5], %s597_s14 }
  0x2b   : > { %v275_v6 = vmax.f32 %v920_v2, %v926_v5  ;;  %v932_v8 = vld [vmem:[%s217_s25 + $0x18] sm:$0xff]  ;;  %v934_v9 = vld [vmem:[%s217_s25] sm:$0xff]  ;;  %v936_v10 = vld [vmem:[%s217_s25 + $0x8] sm:$0xff]  ;;  %v259_v11 = vadd.f32 %v926_v5, %v920_v2  ;;  %670 = vset.pattern.permute.xlu1 %v787_v17  ;;  %s614_s28 = sshll.u32 %s841_s22, 6  ;;  %s514_s14 = sshll.u32 %s244_s8, 4  ;;  %s515_s14 = int_to_ptr.vmem [resolvable:$true] %s514_s14 }
  0x2c   : > { %263 = vadd.xlane.f32.xlu0 %v262_v3  ;;  %279 = vmax.xlane.f32.xlu1 %v278_v4  ;;  %v256_v12 = vadd.f32 %v932_v8, %v930_v7  ;;  %v253_v13 = vadd.f32 %v936_v10, %v934_v9  ;;  %v272_v14 = vmax.f32 %v930_v7, %v932_v8  ;;  %v287_v16 = vld [vmem:[%s1027_s2] sm:$0xff]  ;;  %v289_v40 = vld [vmem:[%s1028_s3 + $0x8] sm:$0xff]  ;;  %v291_v41 = vld [vmem:[%s1028_s3 + $0x18] sm:$0xff]  ;;  %s513_s7 = scalar_lea.hbm %s1030_s5, %s614_s28  ;;  %s502_s11 = scalar_lea.sflag [#allocation4], %s906_s12 }
  0x2d   : > { %276 = vmax.xlane.f32.xlu2 %v275_v6  ;;  %v269_v15 = vmax.f32 %v934_v9, %v936_v10  ;;  %v286_v34 = vld [vmem:[%s1026_s1] sm:$0xff]  ;;  %v290_v42 = vld [vmem:[%s1028_s3 + $0x10] sm:$0xff]  ;;  %v293_v55 = vld [vmem:[%s1029_s4 + $0x8] sm:$0xff]  ;;  %s516_s22 = sshll.u32 %s513_s7, 4  ;;  %s737_s15 = scalar_lea.hbm %s1030_s5, 128  ;;  %s517_s22 = int_to_ptr.hbm [resolvable:$true] %s516_s22 }
  0x2e   : > { %v288_v39 = vld [vmem:[%s1028_s3] sm:$0xff]  ;;  %v382_v57 = vmul.f32 2.0, %v293_v55  ;;  %v294_v60 = vld [vmem:[%s1029_s4 + $0x10] sm:$0xff]  ;;  %v295_v61 = vld [vmem:[%s1029_s4 + $0x18] sm:$0xff]  ;;  %s731_s23 = sshra.s32 %s517_s22, 4  ;;  %s732_s23 = int_to_ptr.hbm [resolvable:$true] %s731_s23 }
  0x2f   : > { %v292_v51 = vld [vmem:[%s1029_s4] sm:$0xff]  ;;  %v383_v4 = vmul.f32 2.0, %v294_v60  ;;  %v384_v6 = vmul.f32 2.0, %v295_v61  ;;  %s733_s25 = scalar_lea.hbm %s732_s23, 64  ;;  %p738_p0 = scmp.lt.s32.totalorder %s732_s23, %s1030_s5 }
  0x30   : > { %v381_v52 = vmul.f32 2.0, %v292_v51  ;;  %p734_p6 = scmp.ne.s32.totalorder %s732_s23, %s733_s25  ;;  %p739_p1 = scmp.lt.s32.totalorder %s737_s15, %s733_s25 }
  0x32   : > { %p735_p9 = pnand %p734_p6, %p870_p11  ;;  %p740_p3 = por %p739_p1, %p738_p0 }
  0x34   : > { %260 = vadd.xlane.f32.xlu0 %v259_v11  ;;  %257 = vadd.xlane.f32.xlu1 %v256_v12  ;;  %p736_p13 = pneg %p735_p9 }
  0x35   : > { %254 = vadd.xlane.f32.xlu2 %v253_v13 }
  0x36   : > { %p741_p4 = pnand %p740_p3, %p736_p13 }
  0x3c   : > { %273 = vmax.xlane.f32.xlu0 %v272_v14  ;;  %270 = vmax.xlane.f32.xlu1 %v269_v15 }
  0x4d   : > { %298 = vperm.xlu2 %668, %v287_v16  }
  0x9f   : > { %v264_v18 = vpop.xlane.xlu0 %263  ;;  %v280_v19 = vpop.xlane.xlu1 %279 }
  0xa0   : > { %v268_v20 = vmul.f32 0.00390625, %v264_v18  ;;  %v277_v21 = vpop.xlane.xlu2 %276 }
  0xa2   : > { %v285_v22 = vsel %vm281_vm0, %v268_v20, %v280_v19 }
  0xa3   : > { %317 = vmatpush.msra.mxu0 %v285_v22 }
  0xa7   : > { %v261_v23 = vpop.xlane.xlu0 %260  ;;  %v258_v24 = vpop.xlane.xlu1 %257 }
  0xa8   : > { %v267_v25 = vmul.f32 0.00390625, %v261_v23  ;;  %v255_v26 = vpop.xlane.xlu2 %254  ;;  %v266_v29 = vmul.f32 0.00390625, %v258_v24 }
  0xa9   : > { %v265_v28 = vmul.f32 0.00390625, %v255_v26 }
  0xaa   : > { %v284_v27 = vsel %vm281_vm0, %v267_v25, %v277_v21 }
  0xab   : > { %318 = vmatpush.msra.mxu0 %v284_v27 }
  0xaf   : > { %v274_v30 = vpop.xlane.xlu0 %273  ;;  %v271_v31 = vpop.xlane.xlu1 %270 }
  0xb0   : > { %v283_v32 = vsel %vm281_vm0, %v266_v29, %v274_v30  ;;  %v282_v33 = vsel %vm281_vm0, %v265_v28, %v271_v31  ;;  %v299_v35 = vpop.permute.xlu2 %298 }
  0xb1   : > { %319 = vmatpush.msra.mxu0 %v283_v32 }
  0xb3   : > { %320 = vmatpush.msra.mxu0 %v282_v33 }
  0xb4   : > { %599 = vmatmul.msk.f32.vlgmr.msra.gmra.mxu0 %vm301_vm1, %v286_v34 }
 0x131   : > { %v322_v36 = vpop.f32.mrf.mxu0 }
 0x132   : > { %v323_v37 = vadd.f32 %v322_v36, %v299_v35 }
 0x134   : > { %v325_v38 = vmax.f32 %v323_v37, 0.0 }
 0x136   : > { %354 = vmatpush.msra.mxu1 %v325_v38  ;;  %615 = vmatpush.msra.mxu2 %v325_v38 }
 0x137   : > { %616 = vmatpush.msra.mxu3 %v325_v38  ;;  %600 = vmatmul.msk.f32.vlgmr.msra.gmra.mxu1 %vm326_vm2, %v288_v39 }
 0x138   : > { %601 = vmatmul.msk.f32.vlgmr.msra.gmra.mxu2 %vm326_vm2, %v289_v40  ;;  %603 = vmatmul.msk.f32.vlgmr.msra.gmra.mxu3 %vm326_vm2, %v291_v41 }
 0x140   : > { %602 = vmatmul.msk.f32.gmra.mxu2 %vm326_vm2, %v290_v42 }
 0x1b4   : > { %v356_v43 = vpop.f32.mrf.mxu1 }
 0x1b5   : > { %v369_v44 = vsel %vm368_vm3, %v356_v43, 0.0 }
 0x1b6   : > { %370 = vadd.xlane.f32.xlu0 %v369_v44 }
 0x1bb   : > { %v359_v45 = vpop.f32.mrf.mxu2  ;;  %v365_v47 = vpop.f32.mrf.mxu3 }
 0x1bc   : > { %v372_v46 = vsel %vm368_vm3, %v359_v45, 0.0  ;;  %v378_v48 = vsel %vm368_vm3, %v365_v47, 0.0 }
 0x1bd   : > { %373 = vadd.xlane.f32.xlu1 %v372_v46 }
 0x1c3   : > { %v362_v49 = vpop.f32.mrf.mxu2 }
 0x1c4   : > { %v375_v50 = vsel %vm368_vm3, %v362_v49, 0.0 }
 0x1c5   : > { %376 = vadd.xlane.f32.xlu0 %v375_v50  ;;  %379 = vadd.xlane.f32.xlu1 %v378_v48 }
 0x229   : > { %v371_v53 = vpop.xlane.xlu0 %370 }
 0x22a   : > { %v385_v54 = vadd.f32 %v381_v52, %v371_v53 }
 0x22c   : > { %v604_v56 = vmul.f32 -1.442695, %v385_v54 }
 0x22e   : > { %671 = vpow2.f32 %v604_v56 }
 0x230   : > { %v374_v58 = vpop.xlane.xlu1 %373 }
 0x231   : > { %v386_v59 = vadd.f32 %v382_v57, %v374_v58 }
 0x233   : > { %v605_v62 = vmul.f32 -1.442695, %v386_v59 }
 0x234   : > { %v672_v63 = vpop.eup %671 }
 0x235   : > { %v401_v3 = vadd.f32 1.0, %v672_v63  ;;  %673 = vpow2.f32 %v605_v62 }
 0x237   : > { %675 = vrcp.f32 %v401_v3  ;;  %v416_v22 = vand.u32 2147483648, %v401_v3  ;;  %vm410_vm4 = vweird.f32 %v401_v3  ;;  %v414_v24 = vand.u32 2147483647, %v401_v3 }
 0x238   : > { %v377_v11 = vpop.xlane.xlu0 %376  ;;  %v380_v12 = vpop.xlane.xlu1 %379 }
 0x239   : > { %v387_v13 = vadd.f32 %v383_v4, %v377_v11  ;;  %v388_v14 = vadd.f32 %v384_v6, %v380_v12  ;;  %v417_v30 = vor.u32 1.1754944e-38, %v416_v22  ;;  %vm415_vm7 = vcmp.eq.f32.partialorder %v414_v24, 8.507059e+37 }
 0x23b   : > { %v674_v15 = vpop.eup %673  ;;  %v606_v16 = vmul.f32 -1.442695, %v387_v13  ;;  %v607_v17 = vmul.f32 -1.442695, %v388_v14 }
 0x23c   : > { %v402_v18 = vadd.f32 1.0, %v674_v15 }
 0x23d   : > { %v676_v19 = vpop.eup %675  ;;  %677 = vpow2.f32 %v606_v16 }
 0x23e   : > { %679 = vrcp.f32 %v402_v18  ;;  %v406_v20 = vmul.f32 %v676_v19, %v401_v3  ;;  %vm411_vm5 = vweird.f32 %v676_v19  ;;  %v431_v36 = vand.u32 2147483648, %v402_v18 }
 0x23f   : > { %681 = vpow2.f32 %v607_v17  ;;  %vm412_vm6 = vmor %vm410_vm4, %vm411_vm5  ;;  %v429_v38 = vand.u32 2147483647, %v402_v18  ;;  %vm425_vm9 = vweird.f32 %v402_v18 }
 0x240   : > { %v407_v21 = vsub.f32 1.0, %v406_v20  ;;  %v432_v41 = vor.u32 1.1754944e-38, %v431_v36 }
 0x241   : > { %vm430_vm11 = vcmp.eq.f32.partialorder %v429_v38, 8.507059e+37 }
 0x242   : > { %v408_v23 = vmul.f32 %v676_v19, %v407_v21 }
 0x243   : > { %v678_v25 = vpop.eup %677 }
 0x244   : > { %v680_v26 = vpop.eup %679  ;;  %v403_v27 = vadd.f32 1.0, %v678_v25  ;;  %v409_v28 = vadd.f32 %v676_v19, %v408_v23 }
 0x245   : > { %v682_v29 = vpop.eup %681  ;;  %v421_v31 = vmul.f32 %v680_v26, %v402_v18  ;;  %vm426_vm8 = vweird.f32 %v680_v26 }
 0x246   : > { %683 = vrcp.f32 %v403_v27  ;;  %v404_v32 = vadd.f32 1.0, %v682_v29  ;;  %v413_v33 = vsel %vm412_vm6, %v676_v19, %v409_v28  ;;  %vm427_vm10 = vmor %vm425_vm9, %vm426_vm8  ;;  %vm440_vm12 = vweird.f32 %v403_v27 }
 0x247   : > { %v418_v34 = vsel %vm415_vm7, %v417_v30, %v413_v33  ;;  %v422_v35 = vsub.f32 1.0, %v421_v31  ;;  %v446_v48 = vand.u32 2147483648, %v403_v27  ;;  %v444_v50 = vand.u32 2147483647, %v403_v27 }
 0x248   : > { %685 = vrcp.f32 %v404_v32  ;;  %467 = vperm.xlu0 %669, %v418_v34   ;;  %vm455_vm0 = vweird.f32 %v404_v32  ;;  %v461_v57 = vand.u32 2147483648, %v404_v32  ;;  %v459_v59 = vand.u32 2147483647, %v404_v32 }
 0x249   : > { %v423_v37 = vmul.f32 %v680_v26, %v422_v35  ;;  %v447_v54 = vor.u32 1.1754944e-38, %v446_v48  ;;  %vm445_vm15 = vcmp.eq.f32.partialorder %v444_v50, 8.507059e+37 }
 0x24a   : > { %v462_v60 = vor.u32 1.1754944e-38, %v461_v57  ;;  %vm460_vm3 = vcmp.eq.f32.partialorder %v459_v59, 8.507059e+37 }
 0x24b   : > { %v424_v39 = vadd.f32 %v680_v26, %v423_v37 }
 0x24c   : > { %v684_v40 = vpop.eup %683 }
 0x24d   : > { %v428_v42 = vsel %vm427_vm10, %v680_v26, %v424_v39  ;;  %v436_v43 = vmul.f32 %v684_v40, %v403_v27  ;;  %vm441_vm13 = vweird.f32 %v684_v40 }
 0x24e   : > { %v686_v44 = vpop.eup %685  ;;  %v433_v45 = vsel %vm430_vm11, %v432_v41, %v428_v42  ;;  %vm442_vm14 = vmor %vm440_vm12, %vm441_vm13 }
 0x24f   : > { %472 = vperm.xlu1 %670, %v433_v45   ;;  %v437_v46 = vsub.f32 1.0, %v436_v43  ;;  %v451_v47 = vmul.f32 %v686_v44, %v404_v32  ;;  %vm456_vm1 = vweird.f32 %v686_v44 }
 0x250   : > { %vm457_vm2 = vmor %vm455_vm0, %vm456_vm1 }
 0x251   : > { %v438_v49 = vmul.f32 %v684_v40, %v437_v46  ;;  %v452_v51 = vsub.f32 1.0, %v451_v47 }
 0x253   : > { %v439_v52 = vadd.f32 %v684_v40, %v438_v49  ;;  %v453_v53 = vmul.f32 %v686_v44, %v452_v51 }
 0x255   : > { %v443_v55 = vsel %vm442_vm14, %v684_v40, %v439_v52  ;;  %v454_v58 = vadd.f32 %v686_v44, %v453_v53 }
 0x256   : > { %v448_v56 = vsel %vm445_vm15, %v447_v54, %v443_v55 }
 0x257   : > { %477 = vperm.xlu2 %668, %v448_v56   ;;  %v458_v61 = vsel %vm457_vm2, %v686_v44, %v454_v58 }
 0x258   : > { %v463_v62 = vsel %vm460_vm3, %v462_v60, %v458_v61 }
 0x25f   : > { %482 = vperm.xlu2 %668, %v463_v62  }
 0x2b1   : > { %v478_v63 = vpop.permute.xlu2 %477 }
 0x2b2   : > { %v489_v3 = vmul.f32 %v478_v63, %v920_v2  ;;  %v490_v4 = vmul.f32 %v478_v63, %v926_v5 }
 0x2b4   : > { %497 = vst [vmem:[%s244_s8 + $0x20] sm:$0xff] %v489_v3 }
 0x2b5   : > { %498 = vst [vmem:[%s244_s8 + $0x28] sm:$0xff] %v490_v4 }
 0x2b9   : > { %v483_v6 = vpop.permute.xlu2 %482 }
 0x2ba   : > { %v491_v11 = vmul.f32 %v483_v6, %v916_v0  ;;  %v492_v12 = vmul.f32 %v483_v6, %v918_v1  ;;  %v468_v13 = vpop.permute.xlu0 %467 }
 0x2bb   : > { %v485_v14 = vmul.f32 %v468_v13, %v934_v9  ;;  %v486_v15 = vmul.f32 %v468_v13, %v936_v10 }
 0x2bc   : > { %499 = vst [vmem:[%s244_s8 + $0x30] sm:$0xff] %v491_v11 }
 0x2bd   : > { %500 = vst [vmem:[%s244_s8 + $0x38] sm:$0xff] %v492_v12 }
 0x2be   : > { %493 = vst [vmem:[%s244_s8] sm:$0xff] %v485_v14 }
 0x2bf   : > { %494 = vst [vmem:[%s244_s8 + $0x8] sm:$0xff] %v486_v15 }
 0x2c1   : > { %v473_v0 = vpop.permute.xlu1 %472 }
 0x2c2   : > { %v487_v1 = vmul.f32 %v473_v0, %v930_v7  ;;  %v488_v2 = vmul.f32 %v473_v0, %v932_v8 }
 0x2c4   : > { %495 = vst [vmem:[%s244_s8 + $0x10] sm:$0xff] %v487_v1 }
 0x2c5   : > { %496 = vst [vmem:[%s244_s8 + $0x18] sm:$0xff] %v488_v2 }
 0x2c6   : > { %744 = shalt.err (!%p741_p4)
}
 0x2c7   : > { %s788_s12 = smov 256   ;;  %s789_s26 = smov 16  }
 0x2c8   : > { %619 = dma.vmem_to_hbm [thread:$0]  (%p870_p11), %s515_s14, 1024, %s517_s22, %s502_s11, %s788_s12, %s788_s12, %s789_s26  }
 0x2c9 PF: > { %s531_s8 = sand.u32 1, %s771_s18   ;;  %p1036_p7 = scmp.ge.s32.totalorder %s783_s21, 2 }
 0x2ca   : > { %s532_s28 = scalar_lea.sflag [#allocation4], %s531_s8 }
 0x2cb   : > { %p626_p5 = pnand %p1036_p7, %p874_p12 }
 0x2cd   : > { %p627_p8 = pneg %p626_p5 }
 0x2cf   : > { %766 = dma.done.wait (%p627_p8), %s532_s28, 1024  }
 0x2d0   : > { %768 = vsyncadd (%p627_p8), %s532_s28, 4294966272  ;;  %p18_p10 = scmp.ge.s32.totalorder %s845_s24, 4   ;;  %s1037_s18 = smov %s775_s19 }
 0x2d1   : > { %s1038_s19 = smov %s779_s20  ;;  %s1039_s20 = smov %s857_s27 }
 0x2d2   : > { %s1040_s21 = smov %s845_s24  ;;  %20 = sbr.rel (!%p18_p10) target bundleno = 5 (0x5), region = 85 }
 0x2d7   :  { %538 = vsyncpa [#allocation3], 1 }
 0x2d8   :  { %540 = vsyncpa [#allocation3 + $0x1], 1 }
 0x2d9   :  { %541 = vsyncpa [#allocation4], 1 }
 0x2da   :  { %543 = vsyncpa [#allocation4 + $0x1], 1 }

</bundles_post_ra>
